<compile_context>
chip_gen: v7x
topology: tpu7x:2x2x1
jax: 0.10.0
libtpu: 0.0.40
codegen_flags: <defaults>
</compile_context>

<pallas_src>
import math

import jax
import jax.numpy as jnp
from jax import lax
from jax.experimental import pallas as pl
from jax.experimental.pallas import tpu as pltpu


def _round_up(v, m):
    return ((v + m - 1) // m) * m


def _vmem_capacity_bytes():
    try:
        return int(pltpu.get_tpu_info().vmem_capacity_bytes)
    except Exception:
        return 64 * 1024 * 1024   # conservative fallback: v7x per-TensorCore VMEM


def _pick_tile_c(c_pad, cap):
    """Largest multiple-of-128 divisor of c_pad that is <= cap (at least 128)."""
    cap = max(128, (cap // 128) * 128)
    m = c_pad // 128
    best = 128
    for g in range(1, m + 1):
        if m % g == 0 and 128 * g <= cap:
            best = 128 * g
    return best


def _make_arcface_kernel(margin, scale, matmul_dtype):
    cos_m = math.cos(margin)
    sin_m = math.sin(margin)
    remain = math.sin(math.pi - margin) * margin
    thresh = math.cos(math.pi - margin)
    inv_scale = 1.0 / scale
    f32_matmul = jnp.dtype(matmul_dtype) == jnp.dtype(jnp.float32)

    def kernel(xs_ref, w_ref, label_ref, out_ref):
        j = pl.program_id(0)
        b, tile_c = out_ref.shape

        # xs = scale * normalize(x): pre-computed once in the wrapper, resident in VMEM.
        xs = xs_ref[...]                                          # [B, D] f32

        # Normalize the streamed weight tile in f32 (rsqrt -> EUP slot, mul -> VPU).
        w = w_ref[...].astype(jnp.float32)                        # [TC, D]
        w_inv = lax.rsqrt(jnp.maximum(jnp.sum(w * w, axis=1, keepdims=True), 1e-24))
        w_n = w * w_inv

        # Bulk scaled cosines: contract D with D (no weight transpose), f32 accumulate.
        cos_s = lax.dot_general(
            xs.astype(matmul_dtype), w_n.astype(matmul_dtype),
            dimension_numbers=(((1,), (1,)), ((), ())),
            preferred_element_type=jnp.float32)                   # [B, TC]
        cos_s = jnp.clip(cos_s, -scale, scale)      # == scale * clamp(cos_theta, -1, 1)

        # One-hot of the label column; it lives in at most one class tile.
        label = label_ref[...]                                    # [B, 1] int32
        class_ids = j * tile_c + lax.broadcasted_iota(jnp.int32, (b, tile_c), 1)
        onehot = class_ids == label                               # [B, TC]

        if f32_matmul:
            # cos_s is already exact f32; just gather the label column.
            cosin = jnp.sum(jnp.where(onehot, cos_s, 0.0), axis=1,
                            keepdims=True) * inv_scale
        else:
            # Recompute the [B,1] label-column cosine in f32: bf16 rounding would be
            # amplified by sqrt(1 - cos^2) for well-classified samples.
            w_lab = lax.dot_general(
                onehot.astype(jnp.float32), w_n,
                dimension_numbers=(((1,), (0,)), ((), ())),
                preferred_element_type=jnp.float32)               # [B, D]
            cosin = jnp.sum(xs * w_lab, axis=1, keepdims=True) * inv_scale
        cosin = jnp.clip(cosin, -1.0, 1.0)

        # ArcFace margin, easy_margin=False (only [B, 1]-sized vector work).
        sin_t = jnp.sqrt(jnp.maximum(1.0 - cosin * cosin, 0.0))
        ctm = cosin * cos_m - sin_t * sin_m
        score = jnp.where(cosin > thresh, ctm, cosin - remain)    # [B, 1]

        # Scatter the (scaled) margin score into the label column, lane-dense store.
        out_ref[...] = jnp.where(onehot, score * scale, cos_s).astype(out_ref.dtype)

    return kernel


def fully_connected_layer(x, weight, label, *, margin=0.5, scale=64.0,
                          tile_c=None, matmul_dtype=jnp.bfloat16,
                          weight_dtype=jnp.bfloat16, out_dtype=jnp.float32):
    """ArcFace-mode FullyConnectedLayer forward pass (easy_margin=False)."""
    b, d = x.shape
    c, d2 = weight.shape
    assert d == d2 and label.shape == (b,)

    # ---- hoisted activation normalization (+ folded `* scale`), once per call ----
    xf = x.astype(jnp.float32)
    x_inv = lax.rsqrt(jnp.maximum(jnp.sum(xf * xf, axis=1, keepdims=True), 1e-24))
    xs = xf * (x_inv * scale)                                     # [B, D] f32

    # ---- weight: cast to the streaming dtype; pad the class dim only if needed ----
    w_s = weight if weight.dtype == jnp.dtype(weight_dtype) else weight.astype(weight_dtype)
    if c % 128 == 0:
        c_pad, wp = c, w_s                     # no extra padded HBM copy
    else:
        c_pad = _round_up(c, 128)
        wp = jnp.zeros((c_pad, d), weight_dtype).at[:c].set(w_s)

    lp = label.astype(jnp.int32).reshape(b, 1)

    # ---- generation-aware class-tile sizing / VMEM budget ----
    bytes_w = jnp.dtype(weight_dtype).itemsize
    bytes_out = jnp.dtype(out_dtype).itemsize
    d_lanes = _round_up(d, 128)
    b_sub = _round_up(max(b, 8), 8)
    vmem_cap = _vmem_capacity_bytes()
    budget = int(vmem_cap * 0.6)               # leave headroom for compiler scratch
    resident = b_sub * d_lanes * 4 + 8 * 128 * 4             # xs + label blocks
    per_class = 2 * d_lanes * bytes_w + 2 * b_sub * bytes_out  # dbl-buffered W + out
    cap = max(128, (budget - resident) // max(per_class, 1))
    cap = min(cap, 2048)                       # keep per-step DMA reasonable
    if c_pad >= 256:
        cap = min(cap, c_pad // 2)             # >= 2 tiles -> class axis can shard (v7x)
    if tile_c is not None:
        cap = min(cap, max(128, tile_c))
    tile_c = _pick_tile_c(c_pad, cap)
    grid_c = c_pad // tile_c

    vmem_need = (resident
                 + 2 * tile_c * d_lanes * bytes_w
                 + 2 * b_sub * tile_c * bytes_out
                 + (2 << 20))
    vmem_limit = int(min(int(vmem_cap * 0.75), max(vmem_need, 16 << 20)))

    kernel = _make_arcface_kernel(margin, scale, matmul_dtype)

    def resident_spec(shape, single_buffer):
        # Constant index_map -> never re-DMA'd; single-buffer it to save VMEM.
        if single_buffer and hasattr(pl, "Buffered"):
            try:
                return pl.BlockSpec(shape, lambda j: (0, 0),
                                    pipeline_mode=pl.Buffered(1))
            except TypeError:
                pass
        return pl.BlockSpec(shape, lambda j: (0, 0))

    def run(single_buffer):
        return pl.pallas_call(
            kernel,
            out_shape=jax.ShapeDtypeStruct((b, c_pad), out_dtype),
            grid_spec=pltpu.PrefetchScalarGridSpec(
                num_scalar_prefetch=0,
                grid=(grid_c,),
                in_specs=[
                    resident_spec((b, d), single_buffer),                # xs: resident
                    pl.BlockSpec((tile_c, d), lambda j: (j, 0)),         # W: streamed
                    resident_spec((b, 1), single_buffer),                # label: resident
                ],
                out_specs=pl.BlockSpec((b, tile_c), lambda j: (0, j)),   # lane-dense
            ),
            compiler_params=pltpu.CompilerParams(
                dimension_semantics=("parallel",),   # tile-local margin -> no carry
                vmem_limit_bytes=vmem_limit,
            ),
        )(xs, wp, lp)

    try:
        out = run(single_buffer=True)
    except Exception:
        # Fallback for jax versions where pipeline_mode=pl.Buffered(1) is unsupported.
        out = run(single_buffer=False)

    return out if c_pad == c else out[:, :c]


def _reference(x, weight, label, *, margin=0.5, scale=64.0):
    """Pure-JAX reference mirroring the PyTorch forward (arcface, easy_margin=False)."""
    cos_m, sin_m = math.cos(margin), math.sin(margin)
    remain = math.sin(math.pi - margin) * margin
    thresh = math.cos(math.pi - margin)
    xn = x / jnp.maximum(jnp.linalg.norm(x, axis=1, keepdims=True), 1e-12)
    wn = weight / jnp.maximum(jnp.linalg.norm(weight, axis=1, keepdims=True), 1e-12)
    cos_theta = jnp.clip(xn @ wn.T, -1.0, 1.0)
    cosin = cos_theta[jnp.arange(x.shape[0]), label][:, None]
    sin = jnp.sqrt(jnp.maximum(1.0 - cosin ** 2, 0.0))
    ctm = cosin * cos_m - sin * sin_m
    score = jnp.where(cosin > thresh, ctm, cosin - remain)
    onehot = jnp.arange(weight.shape[0])[None, :] == label[:, None]
    return jnp.where(onehot, score, cos_theta) * scale


if __name__ == "__main__":
    # module config: in_feats=64, classnum=16, margin=0.5, scale=64.0, fc_mode='arcface'
    B, IN_FEATS, CLASSNUM = 8, 64, 16
    MARGIN, SCALE = 0.5, 64.0

    key = jax.random.PRNGKey(0)
    kx, kw, kl = jax.random.split(key, 3)
    x = jax.random.normal(kx, (B, IN_FEATS), dtype=jnp.float32)
    bound = math.sqrt(6.0 / (CLASSNUM + IN_FEATS))      # xavier_uniform_
    weight = jax.random.uniform(kw, (CLASSNUM, IN_FEATS), jnp.float32, -bound, bound)
    label = jax.random.randint(kl, (B,), 0, CLASSNUM, dtype=jnp.int32)

    ref = _reference(x, weight, label, margin=MARGIN, scale=SCALE)

    # Default path: bf16 weight stream / bf16 MXU (f32 accumulate + f32 label column).
    out = fully_connected_layer(x, weight, label, margin=MARGIN, scale=SCALE)
    out = jax.block_until_ready(out)
    assert out.shape == (B, CLASSNUM)
    rows = jnp.arange(B)
    # Label-column (margin) logits are recomputed in f32 -> tight tolerance.
    assert jnp.allclose(out[rows, label], ref[rows, label], atol=2e-3, rtol=1e-3)
    # Bulk logits carry bf16 matmul rounding on values scaled by 64.
    assert jnp.allclose(out, ref, atol=0.5, rtol=0.02)

    # Full-precision path: must match the reference tightly.
    out32 = fully_connected_layer(x, weight, label, margin=MARGIN, scale=SCALE,
                                  matmul_dtype=jnp.float32, weight_dtype=jnp.float32)
    out32 = jax.block_until_ready(out32)
    assert jnp.allclose(out32, ref, atol=1e-4, rtol=1e-4)

    print("KERNEL_OK")
</pallas_src>

<mosaic_0001>
module attributes {stable_mosaic.version = 11 : i64} {
  func.func @kernel(%arg0: i32, %arg1: memref<8x64xf32, #tpu.memory_space<vmem>>, %arg2: memref<128x64xbf16, #tpu.memory_space<vmem>>, %arg3: memref<8x1xi32, #tpu.memory_space<vmem>>, %arg4: memref<8x128xf32, #tpu.memory_space<vmem>>) attributes {dimension_semantics = [#tpu.dimension_semantics<parallel>], iteration_bounds = array<i64: 1>, scalar_prefetch = 0 : i64, scratch_operands = 0 : i64, tpu.core_type = #tpu.core_type<tc>, window_params = [{pipeline_mode = #tpu.pipeline_mode<synchronous>, transform_indices = @transform_0, window_bounds = array<i64: 8, 64>}, {transform_indices = @transform_1, window_bounds = array<i64: 128, 64>}, {pipeline_mode = #tpu.pipeline_mode<synchronous>, transform_indices = @transform_2, window_bounds = array<i64: 8, 1>}, {transform_indices = @transform_3, window_bounds = array<i64: 8, 128>}]} {
    %c0 = arith.constant 0 : index
    %c0_0 = arith.constant 0 : index
    %0 = vector.load %arg1[%c0, %c0_0] : memref<8x64xf32, #tpu.memory_space<vmem>>, vector<8x64xf32>
    %c0_1 = arith.constant 0 : index
    %c0_2 = arith.constant 0 : index
    %1 = vector.load %arg2[%c0_1, %c0_2] : memref<128x64xbf16, #tpu.memory_space<vmem>>, vector<128x64xbf16>
    %2 = arith.extf %1 : vector<128x64xbf16> to vector<128x64xf32>
    %3 = arith.mulf %2, %2 : vector<128x64xf32>
    %cst = arith.constant dense<0.000000e+00> : vector<128xf32>
    %4 = vector.multi_reduction <add>, %3, %cst [1] : vector<128x64xf32> to vector<128xf32>
    %5 = vector.shape_cast %4 : vector<128xf32> to vector<128x1xf32>
    %cst_3 = arith.constant 1.000000e-24 : f32
    %6 = vector.broadcast %cst_3 : f32 to vector<128x1xf32>
    %7 = arith.maximumf %5, %6 : vector<128x1xf32>
    %8 = math.rsqrt %7 : vector<128x1xf32>
    %9 = vector.broadcast %8 : vector<128x1xf32> to vector<128x64xf32>
    %10 = arith.mulf %2, %9 : vector<128x64xf32>
    %11 = arith.truncf %0 : vector<8x64xf32> to vector<8x64xbf16>
    %12 = arith.truncf %10 : vector<128x64xf32> to vector<128x64xbf16>
    %cst_4 = arith.constant dense<0.000000e+00> : vector<8x128xf32>
    %13 = tpu.matmul %11, %12, %cst_4 {dimension_numbers = #tpu.dot_dimension_numbers<[1], [1], [0], [0], [0, 0, 1, 0], [], []>} : vector<8x64xbf16>, vector<128x64xbf16>, vector<8x128xf32> -> vector<8x128xf32>
    %cst_5 = arith.constant -6.400000e+01 : f32
    %cst_6 = arith.constant 6.400000e+01 : f32
    %14 = vector.broadcast %cst_5 : f32 to vector<8x128xf32>
    %15 = arith.maximumf %14, %13 : vector<8x128xf32>
    %16 = vector.broadcast %cst_6 : f32 to vector<8x128xf32>
    %17 = arith.minimumf %16, %15 : vector<8x128xf32>
    %c0_7 = arith.constant 0 : index
    %c0_8 = arith.constant 0 : index
    %18 = vector.load %arg3[%c0_7, %c0_8] : memref<8x1xi32, #tpu.memory_space<vmem>>, vector<8x1xi32>
    %c128_i32 = arith.constant 128 : i32
    %19 = arith.muli %arg0, %c128_i32 : i32
    %20 = tpu.iota {dimensions = array<i32: 1>} : vector<8x128xi32>
    %21 = vector.broadcast %19 : i32 to vector<8x128xi32>
    %22 = arith.addi %21, %20 : vector<8x128xi32>
    %23 = vector.broadcast %18 : vector<8x1xi32> to vector<8x128xi32>
    %24 = arith.cmpi eq, %22, %23 : vector<8x128xi32>
    %25 = arith.extui %24 : vector<8x128xi1> to vector<8x128xi32>
    %26 = arith.sitofp %25 : vector<8x128xi32> to vector<8x128xf32>
    %cst_9 = arith.constant dense<0.000000e+00> : vector<8x64xf32>
    %27 = tpu.matmul %26, %10, %cst_9 {dimension_numbers = #tpu.dot_dimension_numbers<[1], [0], [0], [1], [0, 0, 1, 1], [], []>} : vector<8x128xf32>, vector<128x64xf32>, vector<8x64xf32> -> vector<8x64xf32>
    %28 = arith.mulf %0, %27 : vector<8x64xf32>
    %cst_10 = arith.constant dense<0.000000e+00> : vector<8xf32>
    %29 = vector.multi_reduction <add>, %28, %cst_10 [1] : vector<8x64xf32> to vector<8xf32>
    %30 = vector.shape_cast %29 : vector<8xf32> to vector<8x1xf32>
    %cst_11 = arith.constant 1.562500e-02 : f32
    %31 = vector.broadcast %cst_11 : f32 to vector<8x1xf32>
    %32 = arith.mulf %30, %31 : vector<8x1xf32>
    %cst_12 = arith.constant -1.000000e+00 : f32
    %cst_13 = arith.constant 1.000000e+00 : f32
    %33 = vector.broadcast %cst_12 : f32 to vector<8x1xf32>
    %34 = arith.maximumf %33, %32 : vector<8x1xf32>
    %35 = vector.broadcast %cst_13 : f32 to vector<8x1xf32>
    %36 = arith.minimumf %35, %34 : vector<8x1xf32>
    %37 = arith.mulf %36, %36 : vector<8x1xf32>
    %cst_14 = arith.constant 1.000000e+00 : f32
    %38 = vector.broadcast %cst_14 : f32 to vector<8x1xf32>
    %39 = arith.subf %38, %37 : vector<8x1xf32>
    %cst_15 = arith.constant 0.000000e+00 : f32
    %40 = vector.broadcast %cst_15 : f32 to vector<8x1xf32>
    %41 = arith.maximumf %39, %40 : vector<8x1xf32>
    %42 = math.sqrt %41 : vector<8x1xf32>
    %cst_16 = arith.constant 0.87758255 : f32
    %43 = vector.broadcast %cst_16 : f32 to vector<8x1xf32>
    %44 = arith.mulf %36, %43 : vector<8x1xf32>
    %cst_17 = arith.constant 0.47942555 : f32
    %45 = vector.broadcast %cst_17 : f32 to vector<8x1xf32>
    %46 = arith.mulf %42, %45 : vector<8x1xf32>
    %47 = arith.subf %44, %46 : vector<8x1xf32>
    %cst_18 = arith.constant -0.87758255 : f32
    %48 = vector.broadcast %cst_18 : f32 to vector<8x1xf32>
    %49 = arith.cmpf ogt, %36, %48 : vector<8x1xf32>
    %cst_19 = arith.constant 0.239712775 : f32
    %50 = vector.broadcast %cst_19 : f32 to vector<8x1xf32>
    %51 = arith.subf %36, %50 : vector<8x1xf32>
    %52 = arith.select %49, %47, %51 : vector<8x1xi1>, vector<8x1xf32>
    %cst_20 = arith.constant 6.400000e+01 : f32
    %53 = vector.broadcast %cst_20 : f32 to vector<8x1xf32>
    %54 = arith.mulf %52, %53 : vector<8x1xf32>
    %55 = vector.shape_cast %54 : vector<8x1xf32> to vector<8x1xf32>
    %56 = vector.broadcast %55 : vector<8x1xf32> to vector<8x128xf32>
    %57 = arith.select %24, %56, %17 : vector<8x128xi1>, vector<8x128xf32>
    %c0_21 = arith.constant 0 : index
    %c0_22 = arith.constant 0 : index
    %58 = vector.load %arg4[%c0_21, %c0_22] : memref<8x128xf32, #tpu.memory_space<vmem>>, vector<8x128xf32>
    tpu.vector_store %arg4[%c0_21, %c0_22], %57 {strides = array<i32>} : memref<8x128xf32, #tpu.memory_space<vmem>>, vector<8x128xf32>,
    return
  }
  func.func @transform_0(%arg0: i32) -> (i32, i32) {
    %c0_i32 = arith.constant 0 : i32
    %c0_i32_0 = arith.constant 0 : i32
    %c0_i32_1 = arith.constant 0 : i32
    return %c0_i32, %c0_i32_0 : i32, i32
  }
  func.func @transform_1(%arg0: i32) -> (i32, i32) {
    %c0_i32 = arith.constant 0 : i32
    %c0_i32_0 = arith.constant 0 : i32
    return %arg0, %c0_i32 : i32, i32
  }
  func.func @transform_2(%arg0: i32) -> (i32, i32) {
    %c0_i32 = arith.constant 0 : i32
    %c0_i32_0 = arith.constant 0 : i32
    %c0_i32_1 = arith.constant 0 : i32
    return %c0_i32, %c0_i32_0 : i32, i32
  }
  func.func @transform_3(%arg0: i32) -> (i32, i32) {
    %c0_i32 = arith.constant 0 : i32
    %c0_i32_0 = arith.constant 0 : i32
    return %c0_i32, %arg0 : i32, i32
  }
}

module attributes {stable_mosaic.version = 11 : i64} {
  func.func @kernel(%arg0: i32, %arg1: memref<8x64xf32, #tpu.memory_space<vmem>>, %arg2: memref<128x64xbf16, #tpu.memory_space<vmem>>, %arg3: memref<8x1xi32, #tpu.memory_space<vmem>>, %arg4: memref<8x128xf32, #tpu.memory_space<vmem>>) attributes {dimension_semantics = [#tpu.dimension_semantics<parallel>], iteration_bounds = array<i64: 1>, scalar_prefetch = 0 : i64, scratch_operands = 0 : i64, tpu.core_type = #tpu.core_type<tc>, window_params = [{pipeline_mode = #tpu.pipeline_mode<synchronous>, transform_indices = @transform_0, window_bounds = array<i64: 8, 64>}, {transform_indices = @transform_1, window_bounds = array<i64: 128, 64>}, {pipeline_mode = #tpu.pipeline_mode<synchronous>, transform_indices = @transform_2, window_bounds = array<i64: 8, 1>}, {transform_indices = @transform_3, window_bounds = array<i64: 8, 128>}]} {
    %c0 = arith.constant 0 : index
    %c0_0 = arith.constant 0 : index
    %0 = vector.load %arg1[%c0, %c0_0] : memref<8x64xf32, #tpu.memory_space<vmem>>, vector<8x64xf32>
    %c0_1 = arith.constant 0 : index
    %c0_2 = arith.constant 0 : index
    %1 = vector.load %arg2[%c0_1, %c0_2] : memref<128x64xbf16, #tpu.memory_space<vmem>>, vector<128x64xbf16>
    %2 = arith.extf %1 : vector<128x64xbf16> to vector<128x64xf32>
    %3 = arith.mulf %2, %2 : vector<128x64xf32>
    %cst = arith.constant dense<0.000000e+00> : vector<128xf32>
    %4 = vector.multi_reduction <add>, %3, %cst [1] : vector<128x64xf32> to vector<128xf32>
    %5 = vector.shape_cast %4 : vector<128xf32> to vector<128x1xf32>
    %cst_3 = arith.constant 1.000000e-24 : f32
    %6 = vector.broadcast %cst_3 : f32 to vector<128x1xf32>
    %7 = arith.maximumf %5, %6 : vector<128x1xf32>
    %8 = math.rsqrt %7 : vector<128x1xf32>
    %9 = vector.broadcast %8 : vector<128x1xf32> to vector<128x64xf32>
    %10 = arith.mulf %2, %9 : vector<128x64xf32>
    %11 = arith.truncf %0 : vector<8x64xf32> to vector<8x64xbf16>
    %12 = arith.truncf %10 : vector<128x64xf32> to vector<128x64xbf16>
    %cst_4 = arith.constant dense<0.000000e+00> : vector<8x128xf32>
    %13 = tpu.matmul %11, %12, %cst_4 {dimension_numbers = #tpu.dot_dimension_numbers<[1], [1], [0], [0], [0, 0, 1, 0], [], []>} : vector<8x64xbf16>, vector<128x64xbf16>, vector<8x128xf32> -> vector<8x128xf32>
    %cst_5 = arith.constant -6.400000e+01 : f32
    %cst_6 = arith.constant 6.400000e+01 : f32
    %14 = vector.broadcast %cst_5 : f32 to vector<8x128xf32>
    %15 = arith.maximumf %14, %13 : vector<8x128xf32>
    %16 = vector.broadcast %cst_6 : f32 to vector<8x128xf32>
    %17 = arith.minimumf %16, %15 : vector<8x128xf32>
    %c0_7 = arith.constant 0 : index
    %c0_8 = arith.constant 0 : index
    %18 = vector.load %arg3[%c0_7, %c0_8] : memref<8x1xi32, #tpu.memory_space<vmem>>, vector<8x1xi32>
    %c128_i32 = arith.constant 128 : i32
    %19 = arith.muli %arg0, %c128_i32 : i32
    %20 = tpu.iota {dimensions = array<i32: 1>} : vector<8x128xi32>
    %21 = vector.broadcast %19 : i32 to vector<8x128xi32>
    %22 = arith.addi %21, %20 : vector<8x128xi32>
    %23 = vector.broadcast %18 : vector<8x1xi32> to vector<8x128xi32>
    %24 = arith.cmpi eq, %22, %23 : vector<8x128xi32>
    %25 = arith.extui %24 : vector<8x128xi1> to vector<8x128xi32>
    %26 = arith.sitofp %25 : vector<8x128xi32> to vector<8x128xf32>
    %cst_9 = arith.constant dense<0.000000e+00> : vector<8x64xf32>
    %27 = tpu.matmul %26, %10, %cst_9 {dimension_numbers = #tpu.dot_dimension_numbers<[1], [0], [0], [1], [0, 0, 1, 1], [], []>} : vector<8x128xf32>, vector<128x64xf32>, vector<8x64xf32> -> vector<8x64xf32>
    %28 = arith.mulf %0, %27 : vector<8x64xf32>
    %cst_10 = arith.constant dense<0.000000e+00> : vector<8xf32>
    %29 = vector.multi_reduction <add>, %28, %cst_10 [1] : vector<8x64xf32> to vector<8xf32>
    %30 = vector.shape_cast %29 : vector<8xf32> to vector<8x1xf32>
    %cst_11 = arith.constant 1.562500e-02 : f32
    %31 = vector.broadcast %cst_11 : f32 to vector<8x1xf32>
    %32 = arith.mulf %30, %31 : vector<8x1xf32>
    %cst_12 = arith.constant -1.000000e+00 : f32
    %cst_13 = arith.constant 1.000000e+00 : f32
    %33 = vector.broadcast %cst_12 : f32 to vector<8x1xf32>
    %34 = arith.maximumf %33, %32 : vector<8x1xf32>
    %35 = vector.broadcast %cst_13 : f32 to vector<8x1xf32>
    %36 = arith.minimumf %35, %34 : vector<8x1xf32>
    %37 = arith.mulf %36, %36 : vector<8x1xf32>
    %cst_14 = arith.constant 1.000000e+00 : f32
    %38 = vector.broadcast %cst_14 : f32 to vector<8x1xf32>
    %39 = arith.subf %38, %37 : vector<8x1xf32>
    %cst_15 = arith.constant 0.000000e+00 : f32
    %40 = vector.broadcast %cst_15 : f32 to vector<8x1xf32>
    %41 = arith.maximumf %39, %40 : vector<8x1xf32>
    %42 = math.sqrt %41 : vector<8x1xf32>
    %cst_16 = arith.constant 0.87758255 : f32
    %43 = vector.broadcast %cst_16 : f32 to vector<8x1xf32>
    %44 = arith.mulf %36, %43 : vector<8x1xf32>
    %cst_17 = arith.constant 0.47942555 : f32
    %45 = vector.broadcast %cst_17 : f32 to vector<8x1xf32>
    %46 = arith.mulf %42, %45 : vector<8x1xf32>
    %47 = arith.subf %44, %46 : vector<8x1xf32>
    %cst_18 = arith.constant -0.87758255 : f32
    %48 = vector.broadcast %cst_18 : f32 to vector<8x1xf32>
    %49 = arith.cmpf ogt, %36, %48 : vector<8x1xf32>
    %cst_19 = arith.constant 0.239712775 : f32
    %50 = vector.broadcast %cst_19 : f32 to vector<8x1xf32>
    %51 = arith.subf %36, %50 : vector<8x1xf32>
    %52 = arith.select %49, %47, %51 : vector<8x1xi1>, vector<8x1xf32>
    %cst_20 = arith.constant 6.400000e+01 : f32
    %53 = vector.broadcast %cst_20 : f32 to vector<8x1xf32>
    %54 = arith.mulf %52, %53 : vector<8x1xf32>
    %55 = vector.shape_cast %54 : vector<8x1xf32> to vector<8x1xf32>
    %56 = vector.broadcast %55 : vector<8x1xf32> to vector<8x128xf32>
    %57 = arith.select %24, %56, %17 : vector<8x128xi1>, vector<8x128xf32>
    %c0_21 = arith.constant 0 : index
    %c0_22 = arith.constant 0 : index
    %58 = vector.load %arg4[%c0_21, %c0_22] : memref<8x128xf32, #tpu.memory_space<vmem>>, vector<8x128xf32>
    tpu.vector_store %arg4[%c0_21, %c0_22], %57 {strides = array<i32>} : memref<8x128xf32, #tpu.memory_space<vmem>>, vector<8x128xf32>,
    return
  }
  func.func @transform_0(%arg0: i32) -> (i32, i32) {
    %c0_i32 = arith.constant 0 : i32
    %c0_i32_0 = arith.constant 0 : i32
    %c0_i32_1 = arith.constant 0 : i32
    return %c0_i32, %c0_i32_0 : i32, i32
  }
  func.func @transform_1(%arg0: i32) -> (i32, i32) {
    %c0_i32 = arith.constant 0 : i32
    %c0_i32_0 = arith.constant 0 : i32
    return %arg0, %c0_i32 : i32, i32
  }
  func.func @transform_2(%arg0: i32) -> (i32, i32) {
    %c0_i32 = arith.constant 0 : i32
    %c0_i32_0 = arith.constant 0 : i32
    %c0_i32_1 = arith.constant 0 : i32
    return %c0_i32, %c0_i32_0 : i32, i32
  }
  func.func @transform_3(%arg0: i32) -> (i32, i32) {
    %c0_i32 = arith.constant 0 : i32
    %c0_i32_0 = arith.constant 0 : i32
    return %c0_i32, %arg0 : i32, i32
  }
}

</mosaic_0001>

<bundles_post_ra>
// kernel: tpu_custom_call.1
= control target key start
LH: loop header
LB: loop body
LE: loop exit
PB: predicated region body
PF: predicated region fallthrough
CT: control target
= control target key end

     0   :  { %v577_v7 = vmov 0   ;;  %vm65_vm0 = vcmask 523264   ;;  %s771_s0 = inlined_call_operand.vmem [shape: f32[8,64], index: 0, kind: input, shape index: {}]   ;;  %s772_s1 = inlined_call_operand.vmem [shape: bf16[128,64], index: 1, kind: input, shape index: {}]   ;;  %s773_s2 = inlined_call_operand.vmem [shape: s32[8,1], index: 2, kind: input, shape index: {}]   ;;  %s774_s3 = inlined_call_operand.hbm [shape: f32[8,128], index: 3, kind: output, shape index: {}]  }
   0x1   :  { %v400_v0 = vld [vmem:[%s772_s1 + $0x8] sm:$0xff]   ;;  %v369_v1 = vld [vmem:[%s772_s1] sm:$0xff]   ;;  %v401_v2 = vld [vmem:[%s772_s1 + $0x10] sm:$0xff]   ;;  %518 = vset.pattern.permute.xlu0 %v577_v7 }
   0x2   :  { %v612_v3 = vunpack.c.l.bf16 %v400_v0  ;;  %v614_v4 = vunpack.c.l.bf16 %v369_v1  ;;  %v616_v5 = vunpack.c.h.bf16 %v400_v0  ;;  %v618_v6 = vunpack.c.h.bf16 %v369_v1  ;;  %v402_v14 = vld [vmem:[%s772_s1 + $0x18] sm:$0xff]  }
   0x3   :  { %v620_v8 = vunpack.c.h.bf16 %v401_v2  ;;  %v622_v9 = vunpack.c.l.bf16 %v401_v2 }
   0x4   :  { %v51_v10 = vmul.f32 %v612_v3, %v612_v3  ;;  %v49_v11 = vmul.f32 %v614_v4, %v614_v4  ;;  %v52_v12 = vmul.f32 %v616_v5, %v616_v5  ;;  %v50_v13 = vmul.f32 %v618_v6, %v618_v6 }
   0x5   :  { %8 = vsyncpa [#allocation3], 0  ;;  %v637_v17 = vunpack.c.h.bf16 %v402_v14  ;;  %v639_v18 = vunpack.c.l.bf16 %v402_v14  ;;  %v54_v21 = vmul.f32 %v620_v8, %v620_v8  ;;  %v53_v22 = vmul.f32 %v622_v9, %v622_v9  ;;  %v403_v23 = vld [vmem:[%s772_s1 + $0x20] sm:$0xff]   ;;  %v404_v30 = vld [vmem:[%s772_s1 + $0x28] sm:$0xff]  }
   0x6   :  { %v72_v15 = vsel %vm65_vm0, %v51_v10, 0.0  ;;  %v66_v16 = vsel %vm65_vm0, %v49_v11, 0.0  ;;  %v75_v19 = vsel %vm65_vm0, %v52_v12, 0.0  ;;  %v69_v20 = vsel %vm65_vm0, %v50_v13, 0.0  ;;  %v405_v37 = vld [vmem:[%s772_s1 + $0x30] sm:$0xff]   ;;  %v406_v44 = vld [vmem:[%s772_s1 + $0x38] sm:$0xff]  }
   0x7   :  { %73 = vadd.xlane.f32.xlu1 %v72_v15  ;;  %67 = vadd.xlane.f32.xlu0 %v66_v16  ;;  %v56_v24 = vmul.f32 %v637_v17, %v637_v17  ;;  %v55_v25 = vmul.f32 %v639_v18, %v639_v18  ;;  %v81_v26 = vsel %vm65_vm0, %v54_v21, 0.0  ;;  %v78_v27 = vsel %vm65_vm0, %v53_v22, 0.0  ;;  %v240_v59 = vld [vmem:[%s773_s2] sm:$0xff] }
   0x8   :  { %v656_v28 = vunpack.c.h.bf16 %v403_v23  ;;  %v658_v29 = vunpack.c.l.bf16 %v403_v23  ;;  %v669_v35 = vunpack.c.h.bf16 %v404_v30  ;;  %v671_v36 = vunpack.c.l.bf16 %v404_v30 }
   0x9   :  { %v87_v31 = vsel %vm65_vm0, %v56_v24, 0.0  ;;  %v84_v32 = vsel %vm65_vm0, %v55_v25, 0.0  ;;  %v676_v38 = vunpack.c.h.bf16 %v405_v37  ;;  %v678_v39 = vunpack.c.l.bf16 %v405_v37 }
   0xa   :  { %v58_v33 = vmul.f32 %v656_v28, %v656_v28  ;;  %v57_v34 = vmul.f32 %v658_v29, %v658_v29  ;;  %v60_v42 = vmul.f32 %v669_v35, %v669_v35  ;;  %v59_v43 = vmul.f32 %v671_v36, %v671_v36 }
   0xb   :  { %76 = vadd.xlane.f32.xlu1 %v75_v19  ;;  %70 = vadd.xlane.f32.xlu0 %v69_v20  ;;  %v689_v45 = vunpack.c.h.bf16 %v406_v44  ;;  %v691_v46 = vunpack.c.l.bf16 %v406_v44  ;;  %v62_v49 = vmul.f32 %v676_v38, %v676_v38  ;;  %v61_v50 = vmul.f32 %v678_v39, %v678_v39 }
   0xc   :  { %v93_v40 = vsel %vm65_vm0, %v58_v33, 0.0  ;;  %v90_v41 = vsel %vm65_vm0, %v57_v34, 0.0  ;;  %v99_v47 = vsel %vm65_vm0, %v60_v42, 0.0  ;;  %v96_v48 = vsel %vm65_vm0, %v59_v43, 0.0 }
   0xd   :  { %v105_v51 = vsel %vm65_vm0, %v62_v49, 0.0  ;;  %v102_v52 = vsel %vm65_vm0, %v61_v50, 0.0  ;;  %v64_v53 = vmul.f32 %v689_v45, %v689_v45  ;;  %v63_v54 = vmul.f32 %v691_v46, %v691_v46 }
   0xe   :  { %v578_v57 = vmov 0.0|0.0   ;;  %v579_v58 = vmov 0.0   ;;  %vm580_vm1 = vmmov 0  }
   0xf   :  { %82 = vadd.xlane.f32.xlu1 %v81_v26  ;;  %79 = vadd.xlane.f32.xlu0 %v78_v27  ;;  %v111_v55 = vsel %vm65_vm0, %v64_v53, 0.0  ;;  %v108_v56 = vsel %vm65_vm0, %v63_v54, 0.0 }
  0x10   :  { %488 = vmatprep.subr.bf16.mxu1 %v578_v57  ;;  %433 = vmatprep.subr.bf16.mxu0 %v579_v58 }
  0x11   :  { %485 = vmatprep.mubr.msk.f32.mxu1 %vm580_vm1, %v579_v58  ;;  %449 = vmatprep.mubr.msk.bf16.mxu0 %vm580_vm1, %v579_v58 }
  0x13   :  { %88 = vadd.xlane.f32.xlu1 %v87_v31  ;;  %85 = vadd.xlane.f32.xlu0 %v84_v32 }
  0x17   :  { %94 = vadd.xlane.f32.xlu1 %v93_v40  ;;  %91 = vadd.xlane.f32.xlu0 %v90_v41 }
  0x1b   :  { %100 = vadd.xlane.f32.xlu1 %v99_v47  ;;  %97 = vadd.xlane.f32.xlu0 %v96_v48 }
  0x1f   :  { %106 = vadd.xlane.f32.xlu1 %v105_v51  ;;  %103 = vadd.xlane.f32.xlu0 %v102_v52 }
  0x23   :  { %112 = vadd.xlane.f32.xlu1 %v111_v55  ;;  %109 = vadd.xlane.f32.xlu0 %v108_v56 }
  0x39   :  { %247 = vperm.xlu0 %518, %v240_v59  }
  0x94   :  { %v74_v60 = vpop.xlane.xlu1 %73  ;;  %v68_v61 = vpop.xlane.xlu0 %67 }
  0x95   :  { %v116_v62 = vmax.f32 %v74_v60, 1e-24  ;;  %v114_v63 = vmax.f32 %v68_v61, 1e-24 }
  0x97   :  { %519 = vrsqrt.f32 %v116_v62 }
  0x98   :  { %v77_v0 = vpop.xlane.xlu1 %76  ;;  %v71_v1 = vpop.xlane.xlu0 %70  ;;  %521 = vrsqrt.f32 %v114_v63 }
  0x99   :  { %v117_v2 = vmax.f32 %v77_v0, 1e-24  ;;  %v115_v7 = vmax.f32 %v71_v1, 1e-24 }
  0x9b   :  { %523 = vrsqrt.f32 %v117_v2 }
  0x9c   :  { %525 = vrsqrt.f32 %v115_v7  ;;  %v83_v10 = vpop.xlane.xlu1 %82  ;;  %v80_v11 = vpop.xlane.xlu0 %79 }
  0x9d   :  { %v119_v12 = vmax.f32 %v83_v10, 1e-24  ;;  %v118_v13 = vmax.f32 %v80_v11, 1e-24 }
  0x9f   :  { %527 = vrsqrt.f32 %v119_v12 }
  0xa0   :  { %529 = vrsqrt.f32 %v118_v13  ;;  %v89_v14 = vpop.xlane.xlu1 %88  ;;  %v86_v15 = vpop.xlane.xlu0 %85 }
  0xa1   :  { %v121_v16 = vmax.f32 %v89_v14, 1e-24  ;;  %v120_v19 = vmax.f32 %v86_v15, 1e-24  ;;  %v520_v20 = vpop.eup %519 }
  0xa2   :  { %v522_v21 = vpop.eup %521  ;;  %v148_v34 = vmul.f32 %v520_v20, %v612_v3  ;;  %v242_v20 = vlaneseq }
  0xa3   :  { %531 = vrsqrt.f32 %v121_v16  ;;  %v146_v30 = vmul.f32 %v522_v21, %v614_v4 }
  0xa4   :  { %533 = vrsqrt.f32 %v120_v19  ;;  %v95_v22 = vpop.xlane.xlu1 %94  ;;  %v92_v23 = vpop.xlane.xlu0 %91  ;;  %v243_v21 = vand.u32 127, %v242_v20 }
  0xa5   :  { %v524_v24 = vpop.eup %523  ;;  %v123_v25 = vmax.f32 %v95_v22, 1e-24  ;;  %v122_v26 = vmax.f32 %v92_v23, 1e-24  ;;  %v581_v23 = vmov 1.0  }
  0xa6   :  { %v526_v27 = vpop.eup %525  ;;  %v149_v43 = vmul.f32 %v524_v24, %v616_v5 }
  0xa7   :  { %535 = vrsqrt.f32 %v123_v25  ;;  %v147_v31 = vmul.f32 %v526_v27, %v618_v6  ;;  %v16_v25 = vld [vmem:[%s771_s0] sm:$0xff]  ;;  %s582_s0 = smov [#allocation2]  }
  0xa8   :  { %537 = vrsqrt.f32 %v122_v26  ;;  %v101_v32 = vpop.xlane.xlu1 %100  ;;  %v98_v33 = vpop.xlane.xlu0 %97  ;;  %v164_v50 = vpack.c.bf16 %v149_v43, %v148_v34  ;;  %v162_v26 = vpack.c.bf16 %v16_v25, %v16_v25  ;;  %s354_s30 = sshll.u32 %s582_s0, 4  ;;  %s355_s30 = int_to_ptr.vmem [resolvable:$true] %s354_s30 }
  0xa9   :  { %v528_v37 = vpop.eup %527  ;;  %v163_v40 = vpack.c.bf16 %v147_v31, %v146_v30  ;;  %v125_v41 = vmax.f32 %v101_v32, 1e-24  ;;  %v124_v42 = vmax.f32 %v98_v33, 1e-24  ;;  %s553_s4 = scalar_lea.vmem %s355_s30, 128  ;;  %p558_p1 = scmp.lt.s32.totalorder %s355_s30, %s355_s30 }
  0xaa   :  { %v530_v44 = vpop.eup %529  ;;  %v151_v6 = vmul.f32 %v528_v37, %v620_v8  ;;  %v178_v62 = vsel %vm65_vm0, %v164_v50, 0  ;;  %p554_p0 = scmp.ne.s32.totalorder %s355_s30, %s553_s4  ;;  %p559_p2 = scmp.lt.s32.totalorder %s553_s4, %s553_s4 }
  0xab   :  { %490 = vmatpush3.bf16.msra.mxu1 %v163_v40  ;;  %v175_v47 = vsel %vm65_vm0, %v163_v40, 0  ;;  %539 = vrsqrt.f32 %v125_v41  ;;  %v150_v4 = vmul.f32 %v530_v44, %v622_v9 }
  0xac   :  { %434 = vmatpush3.bf16.xpose.msra.mxu0 %v175_v47  ;;  %541 = vrsqrt.f32 %v124_v42  ;;  %491 = vmatprep.subr.bf16.mxu1 %v578_v57  ;;  %v107_v3 = vpop.xlane.xlu1 %106  ;;  %v104_v48 = vpop.xlane.xlu0 %103  ;;  %p560_p3 = por %p559_p2, %p558_p1 }
  0xad   :  { %v532_v49 = vpop.eup %531  ;;  %v127_v51 = vmax.f32 %v107_v3, 1e-24  ;;  %v126_v52 = vmax.f32 %v104_v48, 1e-24  ;;  %435 = vmatprep.subr.bf16.mxu0 %v579_v58  ;;  %v165_v53 = vpack.c.bf16 %v151_v6, %v150_v4 }
  0xae   :  { %v534_v5 = vpop.eup %533  ;;  %v153_v8 = vmul.f32 %v532_v49, %v637_v17  ;;  %p561_p4 = pnand %p560_p3, %p554_p0 }
  0xaf   :  { %493 = vmatpush3.bf16.msra.mxu1 %v164_v50  ;;  %543 = vrsqrt.f32 %v127_v51  ;;  %v152_v9 = vmul.f32 %v534_v5, %v639_v18 }
  0xb0   :  { %545 = vrsqrt.f32 %v126_v52  ;;  %494 = vmatprep.subr.bf16.mxu1 %v578_v57  ;;  %v113_v54 = vpop.xlane.xlu1 %112  ;;  %v110_v55 = vpop.xlane.xlu0 %109 }
  0xb1   :  { %v536_v56 = vpop.eup %535  ;;  %v129_v59 = vmax.f32 %v113_v54, 1e-24  ;;  %v128_v60 = vmax.f32 %v110_v55, 1e-24  ;;  %v166_v63 = vpack.c.bf16 %v153_v8, %v152_v9 }
  0xb2   :  { %v538_v61 = vpop.eup %537  ;;  %v155_v18 = vmul.f32 %v536_v56, %v656_v28  ;;  %v181_v28 = vsel %vm65_vm0, %v165_v53, 0 }
  0xb3   :  { %496 = vmatpush3.bf16.msra.mxu1 %v165_v53  ;;  %547 = vrsqrt.f32 %v129_v59  ;;  %v154_v0 = vmul.f32 %v538_v61, %v658_v29 }
  0xb4   :  { %436 = vmatpush3.bf16.xpose.msra.mxu0 %v178_v62  ;;  %549 = vrsqrt.f32 %v128_v60  ;;  %497 = vmatprep.subr.bf16.mxu1 %v578_v57 }
  0xb5   :  { %v540_v17 = vpop.eup %539  ;;  %437 = vmatprep.subr.bf16.mxu0 %v579_v58  ;;  %v167_v2 = vpack.c.bf16 %v155_v18, %v154_v0 }
  0xb6   :  { %v542_v1 = vpop.eup %541  ;;  %v157_v10 = vmul.f32 %v540_v17, %v669_v35 }
  0xb7   :  { %499 = vmatpush3.bf16.msra.mxu1 %v166_v63  ;;  %v156_v7 = vmul.f32 %v542_v1, %v671_v36 }
  0xb8   :  { %500 = vmatprep.subr.bf16.mxu1 %v578_v57  ;;  %v248_v22 = vpop.permute.xlu0 %247 }
  0xb9   :  { %v544_v11 = vpop.eup %543  ;;  %v168_v12 = vpack.c.bf16 %v157_v10, %v156_v7  ;;  %vm249_vm2 = vcmp.eq.s32.totalorder %v243_v21, %v248_v22 }
  0xba   :  { %v546_v29 = vpop.eup %545  ;;  %v159_v14 = vmul.f32 %v544_v11, %v676_v38 }
  0xbb   :  { %502 = vmatpush3.bf16.msra.mxu1 %v167_v2  ;;  %v158_v13 = vmul.f32 %v546_v29, %v678_v39  ;;  %v184_v39 = vsel %vm65_vm0, %v166_v63, 0 }
  0xbc   :  { %438 = vmatpush3.bf16.xpose.msra.mxu0 %v181_v28  ;;  %503 = vmatprep.subr.bf16.mxu1 %v578_v57 }
  0xbd   :  { %v548_v15 = vpop.eup %547  ;;  %439 = vmatprep.subr.bf16.mxu0 %v579_v58  ;;  %v169_v35 = vpack.c.bf16 %v159_v14, %v158_v13 }
  0xbe   :  { %v550_v36 = vpop.eup %549  ;;  %v161_v19 = vmul.f32 %v548_v15, %v689_v45  ;;  %v187_v45 = vsel %vm65_vm0, %v167_v2, 0 }
  0xbf   :  { %505 = vmatpush3.bf16.msra.mxu1 %v168_v12  ;;  %v160_v16 = vmul.f32 %v550_v36, %v691_v46  ;;  %v190_v46 = vsel %vm65_vm0, %v168_v12, 0 }
  0xc0   :  { %506 = vmatprep.subr.bf16.mxu1 %v578_v57 }
  0xc1   :  { %v170_v38 = vpack.c.bf16 %v161_v19, %v160_v16 }
  0xc3   :  { %508 = vmatpush3.bf16.msra.mxu1 %v169_v35  ;;  %v196_v24 = vsel %vm65_vm0, %v170_v38, 0 }
  0xc4   :  { %440 = vmatpush3.bf16.xpose.msra.mxu0 %v184_v39  ;;  %509 = vmatprep.subr.bf16.mxu1 %v578_v57  ;;  %v193_v57 = vsel %vm65_vm0, %v169_v35, 0 }
  0xc5   :  { %441 = vmatprep.subr.bf16.mxu0 %v579_v58 }
  0xc7   :  { %511 = vmatpush3.bf16.msra.mxu1 %v170_v38 }
  0xca   :  { %486 = vmatmul.mubr.msk.f32.vlgmr.msra.gmra.mrb[0].mxu1 %vm249_vm2, %v581_v23 }
  0xcc   :  { %442 = vmatpush3.bf16.xpose.msra.mxu0 %v187_v45 }
  0xcd   :  { %443 = vmatprep.subr.bf16.mxu0 %v579_v58 }
  0xd4   :  { %444 = vmatpush3.bf16.xpose.msra.mxu0 %v190_v46 }
  0xd5   :  { %445 = vmatprep.subr.bf16.mxu0 %v579_v58 }
  0xdc   :  { %446 = vmatpush3.bf16.xpose.msra.mxu0 %v193_v57 }
  0xdd   :  { %447 = vmatprep.subr.bf16.mxu0 %v579_v58 }
  0xe4   :  { %448 = vmatpush3.bf16.xpose.msra.mxu0 %v196_v24 }
  0xeb   :  { %450 = vmatmul.mubr.msk.bf16.vlgmr.msra.gmra.mrb[0].mxu0 %vm65_vm0, %v162_v26 }
 0x19d   :  { %v318_v27 = vpop.f32.mrb[0].mxu1 }
 0x19e   :  { %v322_v30 = vmul.f32 %v318_v27, %v16_v25  ;;  %v487_v31 = vpop.f32.mrb[1].mxu1 }
 0x1a0   :  { %v323_v32 = vsel %vm65_vm0, %v322_v30, 0.0 }
 0x1a1   :  { %324 = vadd.xlane.f32.xlu1 %v323_v32 }
 0x1be   :  { %v232_v33 = vpop.f32.mrb[0].mxu0 }
 0x1bf   :  { %v451_v34 = vpop.f32.mrb[1].mxu0  ;;  %v363_v53 = vclamps-f32 %v232_v33, 64.0 }
 0x1c0   :  { %v235_v37 = vpop.f32.mrb[2].mxu0 }
 0x1c1   :  { %v452_v58 = vpop.f32.mrb[3].mxu0 }
 0x22e   :  { %v325_v40 = vpop.xlane.xlu1 %324 }
 0x22f   :  { %v326_v41 = vmul.f32 0.015625, %v325_v40 }
 0x231   :  { %v366_v42 = vclamps-f32 %v326_v41, 1.0 }
 0x233   :  { %v329_v43 = vmul.f32 %v366_v42, %v366_v42  ;;  %v339_v50 = vmul.f32 0.87758255, %v366_v42  ;;  %v367_v5 = vadd.f32 -0.23971277, %v366_v42  ;;  %vm342_vm5 = vcmp.gt.f32.partialorder %v366_v42, -0.87758255 }
 0x235   :  { %v330_v44 = vsub.f32 1.0, %v329_v43 }
 0x237   :  { %v331_v47 = vmax.f32 %v330_v44, 0.0 }
 0x239   :  { %551 = vrsqrt.f32 %v331_v47  ;;  %vm334_vm3 = vcmp.eq.f32.partialorder %v331_v47, inf  ;;  %v337_v3 = vand.u32 2147483648, %v331_v47  ;;  %vm336_vm4 = vcmp.eq.f32.partialorder %v331_v47, 0.0 }
 0x243   :  { %v552_v4 = vpop.eup %551 }
 0x244   :  { %v333_v6 = vmul.f32 %v552_v4, %v331_v47 }
 0x246   :  { %v335_v48 = vsel %vm334_vm3, %v331_v47, %v333_v6 }
 0x247   :  { %v338_v49 = vsel %vm336_vm4, %v337_v3, %v335_v48 }
 0x248   :  { %v340_v51 = vmul.f32 0.47942555, %v338_v49 }
 0x24a   :  { %v341_v52 = vsub.f32 %v339_v50, %v340_v51 }
 0x24c   :  { %v344_v9 = vsel %vm342_vm5, %v341_v52, %v367_v5 }
 0x24d   :  { %v345_v8 = vmul.f32 64.0, %v344_v9 }
 0x24f   :  { %v346_v54 = vsel %vm249_vm2, %v345_v8, %v363_v53 }
 0x250   :  { %347 = vst [vmem:[#allocation2] sm:$0xff] %v346_v54 }
 0x251   :  { %564 = shalt.err (!%p561_p4)
}
 0x252   :  { %s565_s7 = scalar_lea.hbm %s774_s3, 128 }
 0x253   :  { %p566_p5 = scmp.ne.s32.totalorder %s774_s3, %s565_s7  ;;  %p569_p6 = scmp.lt.u32.totalorder %s565_s7, %s774_s3 }
 0x255   :  { %p571_p7 = pnand %p569_p6, %p566_p5 }
 0x257   :  { %574 = shalt.err (!%p571_p7)
}
 0x258   :  { %357 = dma.vmem_to_hbm [thread:$0]  %s355_s30, 128, %s774_s3, [#allocation3]  }
 0x259   :  { %575 = dma.done.wait [#allocation3], 128  }
 0x25a   :  { %576 = vsyncadd [#allocation3], 4294967168 }
 0x25b   :  { %361 = vsyncpa [#allocation3], 1 }

// kernel: tpu_custom_call.1
= control target key start
LH: loop header
LB: loop body
LE: loop exit
PB: predicated region body
PF: predicated region fallthrough
CT: control target
= control target key end

     0   :  { %v577_v7 = vmov 0   ;;  %vm65_vm0 = vcmask 523264   ;;  %s771_s0 = inlined_call_operand.vmem [shape: f32[8,64], index: 0, kind: input, shape index: {}]   ;;  %s772_s1 = inlined_call_operand.vmem [shape: bf16[128,64], index: 1, kind: input, shape index: {}]   ;;  %s773_s2 = inlined_call_operand.vmem [shape: s32[8,1], index: 2, kind: input, shape index: {}]   ;;  %s774_s3 = inlined_call_operand.hbm [shape: f32[8,128], index: 3, kind: output, shape index: {}]  }
   0x1   :  { %v400_v0 = vld [vmem:[%s772_s1 + $0x8] sm:$0xff]   ;;  %v369_v1 = vld [vmem:[%s772_s1] sm:$0xff]   ;;  %v401_v2 = vld [vmem:[%s772_s1 + $0x10] sm:$0xff]   ;;  %518 = vset.pattern.permute.xlu0 %v577_v7 }
   0x2   :  { %v612_v3 = vunpack.c.l.bf16 %v400_v0  ;;  %v614_v4 = vunpack.c.l.bf16 %v369_v1  ;;  %v616_v5 = vunpack.c.h.bf16 %v400_v0  ;;  %v618_v6 = vunpack.c.h.bf16 %v369_v1  ;;  %v402_v14 = vld [vmem:[%s772_s1 + $0x18] sm:$0xff]  }
   0x3   :  { %v620_v8 = vunpack.c.h.bf16 %v401_v2  ;;  %v622_v9 = vunpack.c.l.bf16 %v401_v2 }
   0x4   :  { %v51_v10 = vmul.f32 %v612_v3, %v612_v3  ;;  %v49_v11 = vmul.f32 %v614_v4, %v614_v4  ;;  %v52_v12 = vmul.f32 %v616_v5, %v616_v5  ;;  %v50_v13 = vmul.f32 %v618_v6, %v618_v6 }
   0x5   :  { %8 = vsyncpa [#allocation3], 0  ;;  %v637_v17 = vunpack.c.h.bf16 %v402_v14  ;;  %v639_v18 = vunpack.c.l.bf16 %v402_v14  ;;  %v54_v21 = vmul.f32 %v620_v8, %v620_v8  ;;  %v53_v22 = vmul.f32 %v622_v9, %v622_v9  ;;  %v403_v23 = vld [vmem:[%s772_s1 + $0x20] sm:$0xff]   ;;  %v404_v30 = vld [vmem:[%s772_s1 + $0x28] sm:$0xff]  }
   0x6   :  { %v72_v15 = vsel %vm65_vm0, %v51_v10, 0.0  ;;  %v66_v16 = vsel %vm65_vm0, %v49_v11, 0.0  ;;  %v75_v19 = vsel %vm65_vm0, %v52_v12, 0.0  ;;  %v69_v20 = vsel %vm65_vm0, %v50_v13, 0.0  ;;  %v405_v37 = vld [vmem:[%s772_s1 + $0x30] sm:$0xff]   ;;  %v406_v44 = vld [vmem:[%s772_s1 + $0x38] sm:$0xff]  }
   0x7   :  { %73 = vadd.xlane.f32.xlu1 %v72_v15  ;;  %67 = vadd.xlane.f32.xlu0 %v66_v16  ;;  %v56_v24 = vmul.f32 %v637_v17, %v637_v17  ;;  %v55_v25 = vmul.f32 %v639_v18, %v639_v18  ;;  %v81_v26 = vsel %vm65_vm0, %v54_v21, 0.0  ;;  %v78_v27 = vsel %vm65_vm0, %v53_v22, 0.0  ;;  %v240_v59 = vld [vmem:[%s773_s2] sm:$0xff] }
   0x8   :  { %v656_v28 = vunpack.c.h.bf16 %v403_v23  ;;  %v658_v29 = vunpack.c.l.bf16 %v403_v23  ;;  %v669_v35 = vunpack.c.h.bf16 %v404_v30  ;;  %v671_v36 = vunpack.c.l.bf16 %v404_v30 }
   0x9   :  { %v87_v31 = vsel %vm65_vm0, %v56_v24, 0.0  ;;  %v84_v32 = vsel %vm65_vm0, %v55_v25, 0.0  ;;  %v676_v38 = vunpack.c.h.bf16 %v405_v37  ;;  %v678_v39 = vunpack.c.l.bf16 %v405_v37 }
   0xa   :  { %v58_v33 = vmul.f32 %v656_v28, %v656_v28  ;;  %v57_v34 = vmul.f32 %v658_v29, %v658_v29  ;;  %v60_v42 = vmul.f32 %v669_v35, %v669_v35  ;;  %v59_v43 = vmul.f32 %v671_v36, %v671_v36 }
   0xb   :  { %76 = vadd.xlane.f32.xlu1 %v75_v19  ;;  %70 = vadd.xlane.f32.xlu0 %v69_v20  ;;  %v689_v45 = vunpack.c.h.bf16 %v406_v44  ;;  %v691_v46 = vunpack.c.l.bf16 %v406_v44  ;;  %v62_v49 = vmul.f32 %v676_v38, %v676_v38  ;;  %v61_v50 = vmul.f32 %v678_v39, %v678_v39 }
   0xc   :  { %v93_v40 = vsel %vm65_vm0, %v58_v33, 0.0  ;;  %v90_v41 = vsel %vm65_vm0, %v57_v34, 0.0  ;;  %v99_v47 = vsel %vm65_vm0, %v60_v42, 0.0  ;;  %v96_v48 = vsel %vm65_vm0, %v59_v43, 0.0 }
   0xd   :  { %v105_v51 = vsel %vm65_vm0, %v62_v49, 0.0  ;;  %v102_v52 = vsel %vm65_vm0, %v61_v50, 0.0  ;;  %v64_v53 = vmul.f32 %v689_v45, %v689_v45  ;;  %v63_v54 = vmul.f32 %v691_v46, %v691_v46 }
   0xe   :  { %v578_v57 = vmov 0.0|0.0   ;;  %v579_v58 = vmov 0.0   ;;  %vm580_vm1 = vmmov 0  }
   0xf   :  { %82 = vadd.xlane.f32.xlu1 %v81_v26  ;;  %79 = vadd.xlane.f32.xlu0 %v78_v27  ;;  %v111_v55 = vsel %vm65_vm0, %v64_v53, 0.0  ;;  %v108_v56 = vsel %vm65_vm0, %v63_v54, 0.0 }
  0x10   :  { %488 = vmatprep.subr.bf16.mxu1 %v578_v57  ;;  %433 = vmatprep.subr.bf16.mxu0 %v579_v58 }
  0x11   :  { %485 = vmatprep.mubr.msk.f32.mxu1 %vm580_vm1, %v579_v58  ;;  %449 = vmatprep.mubr.msk.bf16.mxu0 %vm580_vm1, %v579_v58 }
  0x13   :  { %88 = vadd.xlane.f32.xlu1 %v87_v31  ;;  %85 = vadd.xlane.f32.xlu0 %v84_v32 }
  0x17   :  { %94 = vadd.xlane.f32.xlu1 %v93_v40  ;;  %91 = vadd.xlane.f32.xlu0 %v90_v41 }
  0x1b   :  { %100 = vadd.xlane.f32.xlu1 %v99_v47  ;;  %97 = vadd.xlane.f32.xlu0 %v96_v48 }
  0x1f   :  { %106 = vadd.xlane.f32.xlu1 %v105_v51  ;;  %103 = vadd.xlane.f32.xlu0 %v102_v52 }
  0x23   :  { %112 = vadd.xlane.f32.xlu1 %v111_v55  ;;  %109 = vadd.xlane.f32.xlu0 %v108_v56 }
  0x39   :  { %247 = vperm.xlu0 %518, %v240_v59  }
  0x94   :  { %v74_v60 = vpop.xlane.xlu1 %73  ;;  %v68_v61 = vpop.xlane.xlu0 %67 }
  0x95   :  { %v116_v62 = vmax.f32 %v74_v60, 1e-24  ;;  %v114_v63 = vmax.f32 %v68_v61, 1e-24 }
  0x97   :  { %519 = vrsqrt.f32 %v116_v62 }
  0x98   :  { %v77_v0 = vpop.xlane.xlu1 %76  ;;  %v71_v1 = vpop.xlane.xlu0 %70  ;;  %521 = vrsqrt.f32 %v114_v63 }
  0x99   :  { %v117_v2 = vmax.f32 %v77_v0, 1e-24  ;;  %v115_v7 = vmax.f32 %v71_v1, 1e-24 }
  0x9b   :  { %523 = vrsqrt.f32 %v117_v2 }
  0x9c   :  { %525 = vrsqrt.f32 %v115_v7  ;;  %v83_v10 = vpop.xlane.xlu1 %82  ;;  %v80_v11 = vpop.xlane.xlu0 %79 }
  0x9d   :  { %v119_v12 = vmax.f32 %v83_v10, 1e-24  ;;  %v118_v13 = vmax.f32 %v80_v11, 1e-24 }
  0x9f   :  { %527 = vrsqrt.f32 %v119_v12 }
  0xa0   :  { %529 = vrsqrt.f32 %v118_v13  ;;  %v89_v14 = vpop.xlane.xlu1 %88  ;;  %v86_v15 = vpop.xlane.xlu0 %85 }
  0xa1   :  { %v121_v16 = vmax.f32 %v89_v14, 1e-24  ;;  %v120_v19 = vmax.f32 %v86_v15, 1e-24  ;;  %v520_v20 = vpop.eup %519 }
  0xa2   :  { %v522_v21 = vpop.eup %521  ;;  %v148_v34 = vmul.f32 %v520_v20, %v612_v3  ;;  %v242_v20 = vlaneseq }
  0xa3   :  { %531 = vrsqrt.f32 %v121_v16  ;;  %v146_v30 = vmul.f32 %v522_v21, %v614_v4 }
  0xa4   :  { %533 = vrsqrt.f32 %v120_v19  ;;  %v95_v22 = vpop.xlane.xlu1 %94  ;;  %v92_v23 = vpop.xlane.xlu0 %91  ;;  %v243_v21 = vand.u32 127, %v242_v20 }
  0xa5   :  { %v524_v24 = vpop.eup %523  ;;  %v123_v25 = vmax.f32 %v95_v22, 1e-24  ;;  %v122_v26 = vmax.f32 %v92_v23, 1e-24  ;;  %v581_v23 = vmov 1.0  }
  0xa6   :  { %v526_v27 = vpop.eup %525  ;;  %v149_v43 = vmul.f32 %v524_v24, %v616_v5 }
  0xa7   :  { %535 = vrsqrt.f32 %v123_v25  ;;  %v147_v31 = vmul.f32 %v526_v27, %v618_v6  ;;  %v16_v25 = vld [vmem:[%s771_s0] sm:$0xff]  ;;  %s582_s0 = smov [#allocation2]  }
  0xa8   :  { %537 = vrsqrt.f32 %v122_v26  ;;  %v101_v32 = vpop.xlane.xlu1 %100  ;;  %v98_v33 = vpop.xlane.xlu0 %97  ;;  %v164_v50 = vpack.c.bf16 %v149_v43, %v148_v34  ;;  %v162_v26 = vpack.c.bf16 %v16_v25, %v16_v25  ;;  %s354_s30 = sshll.u32 %s582_s0, 4  ;;  %s355_s30 = int_to_ptr.vmem [resolvable:$true] %s354_s30 }
  0xa9   :  { %v528_v37 = vpop.eup %527  ;;  %v163_v40 = vpack.c.bf16 %v147_v31, %v146_v30  ;;  %v125_v41 = vmax.f32 %v101_v32, 1e-24  ;;  %v124_v42 = vmax.f32 %v98_v33, 1e-24  ;;  %s553_s4 = scalar_lea.vmem %s355_s30, 128  ;;  %p558_p1 = scmp.lt.s32.totalorder %s355_s30, %s355_s30 }
  0xaa   :  { %v530_v44 = vpop.eup %529  ;;  %v151_v6 = vmul.f32 %v528_v37, %v620_v8  ;;  %v178_v62 = vsel %vm65_vm0, %v164_v50, 0  ;;  %p554_p0 = scmp.ne.s32.totalorder %s355_s30, %s553_s4  ;;  %p559_p2 = scmp.lt.s32.totalorder %s553_s4, %s553_s4 }
  0xab   :  { %490 = vmatpush3.bf16.msra.mxu1 %v163_v40  ;;  %v175_v47 = vsel %vm65_vm0, %v163_v40, 0  ;;  %539 = vrsqrt.f32 %v125_v41  ;;  %v150_v4 = vmul.f32 %v530_v44, %v622_v9 }
  0xac   :  { %434 = vmatpush3.bf16.xpose.msra.mxu0 %v175_v47  ;;  %541 = vrsqrt.f32 %v124_v42  ;;  %491 = vmatprep.subr.bf16.mxu1 %v578_v57  ;;  %v107_v3 = vpop.xlane.xlu1 %106  ;;  %v104_v48 = vpop.xlane.xlu0 %103  ;;  %p560_p3 = por %p559_p2, %p558_p1 }
  0xad   :  { %v532_v49 = vpop.eup %531  ;;  %v127_v51 = vmax.f32 %v107_v3, 1e-24  ;;  %v126_v52 = vmax.f32 %v104_v48, 1e-24  ;;  %435 = vmatprep.subr.bf16.mxu0 %v579_v58  ;;  %v165_v53 = vpack.c.bf16 %v151_v6, %v150_v4 }
  0xae   :  { %v534_v5 = vpop.eup %533  ;;  %v153_v8 = vmul.f32 %v532_v49, %v637_v17  ;;  %p561_p4 = pnand %p560_p3, %p554_p0 }
  0xaf   :  { %493 = vmatpush3.bf16.msra.mxu1 %v164_v50  ;;  %543 = vrsqrt.f32 %v127_v51  ;;  %v152_v9 = vmul.f32 %v534_v5, %v639_v18 }
  0xb0   :  { %545 = vrsqrt.f32 %v126_v52  ;;  %494 = vmatprep.subr.bf16.mxu1 %v578_v57  ;;  %v113_v54 = vpop.xlane.xlu1 %112  ;;  %v110_v55 = vpop.xlane.xlu0 %109 }
  0xb1   :  { %v536_v56 = vpop.eup %535  ;;  %v129_v59 = vmax.f32 %v113_v54, 1e-24  ;;  %v128_v60 = vmax.f32 %v110_v55, 1e-24  ;;  %v166_v63 = vpack.c.bf16 %v153_v8, %v152_v9 }
  0xb2   :  { %v538_v61 = vpop.eup %537  ;;  %v155_v18 = vmul.f32 %v536_v56, %v656_v28  ;;  %v181_v28 = vsel %vm65_vm0, %v165_v53, 0 }
  0xb3   :  { %496 = vmatpush3.bf16.msra.mxu1 %v165_v53  ;;  %547 = vrsqrt.f32 %v129_v59  ;;  %v154_v0 = vmul.f32 %v538_v61, %v658_v29 }
  0xb4   :  { %436 = vmatpush3.bf16.xpose.msra.mxu0 %v178_v62  ;;  %549 = vrsqrt.f32 %v128_v60  ;;  %497 = vmatprep.subr.bf16.mxu1 %v578_v57 }
  0xb5   :  { %v540_v17 = vpop.eup %539  ;;  %437 = vmatprep.subr.bf16.mxu0 %v579_v58  ;;  %v167_v2 = vpack.c.bf16 %v155_v18, %v154_v0 }
  0xb6   :  { %v542_v1 = vpop.eup %541  ;;  %v157_v10 = vmul.f32 %v540_v17, %v669_v35 }
  0xb7   :  { %499 = vmatpush3.bf16.msra.mxu1 %v166_v63  ;;  %v156_v7 = vmul.f32 %v542_v1, %v671_v36 }
  0xb8   :  { %500 = vmatprep.subr.bf16.mxu1 %v578_v57  ;;  %v248_v22 = vpop.permute.xlu0 %247 }
  0xb9   :  { %v544_v11 = vpop.eup %543  ;;  %v168_v12 = vpack.c.bf16 %v157_v10, %v156_v7  ;;  %vm249_vm2 = vcmp.eq.s32.totalorder %v243_v21, %v248_v22 }
  0xba   :  { %v546_v29 = vpop.eup %545  ;;  %v159_v14 = vmul.f32 %v544_v11, %v676_v38 }
  0xbb   :  { %502 = vmatpush3.bf16.msra.mxu1 %v167_v2  ;;  %v158_v13 = vmul.f32 %v546_v29, %v678_v39  ;;  %v184_v39 = vsel %vm65_vm0, %v166_v63, 0 }
  0xbc   :  { %438 = vmatpush3.bf16.xpose.msra.mxu0 %v181_v28  ;;  %503 = vmatprep.subr.bf16.mxu1 %v578_v57 }
  0xbd   :  { %v548_v15 = vpop.eup %547  ;;  %439 = vmatprep.subr.bf16.mxu0 %v579_v58  ;;  %v169_v35 = vpack.c.bf16 %v159_v14, %v158_v13 }
  0xbe   :  { %v550_v36 = vpop.eup %549  ;;  %v161_v19 = vmul.f32 %v548_v15, %v689_v45  ;;  %v187_v45 = vsel %vm65_vm0, %v167_v2, 0 }
  0xbf   :  { %505 = vmatpush3.bf16.msra.mxu1 %v168_v12  ;;  %v160_v16 = vmul.f32 %v550_v36, %v691_v46  ;;  %v190_v46 = vsel %vm65_vm0, %v168_v12, 0 }
  0xc0   :  { %506 = vmatprep.subr.bf16.mxu1 %v578_v57 }
  0xc1   :  { %v170_v38 = vpack.c.bf16 %v161_v19, %v160_v16 }
  0xc3   :  { %508 = vmatpush3.bf16.msra.mxu1 %v169_v35  ;;  %v196_v24 = vsel %vm65_vm0, %v170_v38, 0 }
  0xc4   :  { %440 = vmatpush3.bf16.xpose.msra.mxu0 %v184_v39  ;;  %509 = vmatprep.subr.bf16.mxu1 %v578_v57  ;;  %v193_v57 = vsel %vm65_vm0, %v169_v35, 0 }
  0xc5   :  { %441 = vmatprep.subr.bf16.mxu0 %v579_v58 }
  0xc7   :  { %511 = vmatpush3.bf16.msra.mxu1 %v170_v38 }
  0xca   :  { %486 = vmatmul.mubr.msk.f32.vlgmr.msra.gmra.mrb[0].mxu1 %vm249_vm2, %v581_v23 }
  0xcc   :  { %442 = vmatpush3.bf16.xpose.msra.mxu0 %v187_v45 }
  0xcd   :  { %443 = vmatprep.subr.bf16.mxu0 %v579_v58 }
  0xd4   :  { %444 = vmatpush3.bf16.xpose.msra.mxu0 %v190_v46 }
  0xd5   :  { %445 = vmatprep.subr.bf16.mxu0 %v579_v58 }
  0xdc   :  { %446 = vmatpush3.bf16.xpose.msra.mxu0 %v193_v57 }
  0xdd   :  { %447 = vmatprep.subr.bf16.mxu0 %v579_v58 }
  0xe4   :  { %448 = vmatpush3.bf16.xpose.msra.mxu0 %v196_v24 }
  0xeb   :  { %450 = vmatmul.mubr.msk.bf16.vlgmr.msra.gmra.mrb[0].mxu0 %vm65_vm0, %v162_v26 }
 0x19d   :  { %v318_v27 = vpop.f32.mrb[0].mxu1 }
 0x19e   :  { %v322_v30 = vmul.f32 %v318_v27, %v16_v25  ;;  %v487_v31 = vpop.f32.mrb[1].mxu1 }
 0x1a0   :  { %v323_v32 = vsel %vm65_vm0, %v322_v30, 0.0 }
 0x1a1   :  { %324 = vadd.xlane.f32.xlu1 %v323_v32 }
 0x1be   :  { %v232_v33 = vpop.f32.mrb[0].mxu0 }
 0x1bf   :  { %v451_v34 = vpop.f32.mrb[1].mxu0  ;;  %v363_v53 = vclamps-f32 %v232_v33, 64.0 }
 0x1c0   :  { %v235_v37 = vpop.f32.mrb[2].mxu0 }
 0x1c1   :  { %v452_v58 = vpop.f32.mrb[3].mxu0 }
 0x22e   :  { %v325_v40 = vpop.xlane.xlu1 %324 }
 0x22f   :  { %v326_v41 = vmul.f32 0.015625, %v325_v40 }
 0x231   :  { %v366_v42 = vclamps-f32 %v326_v41, 1.0 }
 0x233   :  { %v329_v43 = vmul.f32 %v366_v42, %v366_v42  ;;  %v339_v50 = vmul.f32 0.87758255, %v366_v42  ;;  %v367_v5 = vadd.f32 -0.23971277, %v366_v42  ;;  %vm342_vm5 = vcmp.gt.f32.partialorder %v366_v42, -0.87758255 }
 0x235   :  { %v330_v44 = vsub.f32 1.0, %v329_v43 }
 0x237   :  { %v331_v47 = vmax.f32 %v330_v44, 0.0 }
 0x239   :  { %551 = vrsqrt.f32 %v331_v47  ;;  %vm334_vm3 = vcmp.eq.f32.partialorder %v331_v47, inf  ;;  %v337_v3 = vand.u32 2147483648, %v331_v47  ;;  %vm336_vm4 = vcmp.eq.f32.partialorder %v331_v47, 0.0 }
 0x243   :  { %v552_v4 = vpop.eup %551 }
 0x244   :  { %v333_v6 = vmul.f32 %v552_v4, %v331_v47 }
 0x246   :  { %v335_v48 = vsel %vm334_vm3, %v331_v47, %v333_v6 }
 0x247   :  { %v338_v49 = vsel %vm336_vm4, %v337_v3, %v335_v48 }
 0x248   :  { %v340_v51 = vmul.f32 0.47942555, %v338_v49 }
 0x24a   :  { %v341_v52 = vsub.f32 %v339_v50, %v340_v51 }
 0x24c   :  { %v344_v9 = vsel %vm342_vm5, %v341_v52, %v367_v5 }
 0x24d   :  { %v345_v8 = vmul.f32 64.0, %v344_v9 }
 0x24f   :  { %v346_v54 = vsel %vm249_vm2, %v345_v8, %v363_v53 }
 0x250   :  { %347 = vst [vmem:[#allocation2] sm:$0xff] %v346_v54 }
 0x251   :  { %564 = shalt.err (!%p561_p4)
}
 0x252   :  { %s565_s7 = scalar_lea.hbm %s774_s3, 128 }
 0x253   :  { %p566_p5 = scmp.ne.s32.totalorder %s774_s3, %s565_s7  ;;  %p569_p6 = scmp.lt.u32.totalorder %s565_s7, %s774_s3 }
 0x255   :  { %p571_p7 = pnand %p569_p6, %p566_p5 }
 0x257   :  { %574 = shalt.err (!%p571_p7)
}
 0x258   :  { %357 = dma.vmem_to_hbm [thread:$0]  %s355_s30, 128, %s774_s3, [#allocation3]  }
 0x259   :  { %575 = dma.done.wait [#allocation3], 128  }
 0x25a   :  { %576 = vsyncadd [#allocation3], 4294967168 }
 0x25b   :  { %361 = vsyncpa [#allocation3], 1 }

</bundles_post_ra>
